<compile_context>
chip_gen: v7x
topology: tpu7x:2x2x1
jax: 0.10.0
libtpu: 0.0.40
codegen_flags: <defaults>
</compile_context>

<pallas_src>
import jax
import jax.numpy as jnp
from jax.experimental import pallas as pl
from jax.experimental.pallas import tpu as pltpu


def _tv_loss_kernel(x_ref, h_out_ref, w_out_ref, acc_h_ref, acc_w_ref):
    """x_ref: (TB, H, W) block of unpadded planes.

    Accumulates reflection-pad-weighted |diff| sums into plane-shaped VMEM
    scratch; writes the two scalar partials once, on the last reduction step.
    """
    tb, h, w = x_ref.shape
    step = pl.program_id(1)          # reduction axis (arbitrary)
    f32 = jnp.float32

    @pl.when(step == 0)
    def _init():
        acc_h_ref[...] = jnp.zeros_like(acc_h_ref)
        acc_w_ref[...] = jnp.zeros_like(acc_w_ref)

    # Compute in f32 (safe on all generations).
    x = x_ref[...].astype(f32)                                   # (TB, H, W)

    # ---- vertical (row) diffs ------------------------------------------------
    # Reduce over the TB planes first (elementwise adds), then apply the
    # reflection multiplicities once per step (fewer VPU multiplies).
    d_h = jnp.sum(jnp.abs(x[:, 1:, :] - x[:, :-1, :]), axis=0)   # (H-1, W)
    ri = jax.lax.broadcasted_iota(jnp.int32, (h - 1, w), 0)      # k
    ci = jax.lax.broadcasted_iota(jnp.int32, (h - 1, w), 1)      # c
    w_h = ((1.0 + (ri == 0).astype(f32) + (ri == h - 2).astype(f32))
           * (1.0 + (ci == 1).astype(f32) + (ci == w - 2).astype(f32)))
    acc_h_ref[...] += d_h * w_h

    # ---- horizontal (column) diffs --------------------------------------------
    d_w = jnp.sum(jnp.abs(x[:, :, 1:] - x[:, :, :-1]), axis=0)   # (H, W-1)
    rj = jax.lax.broadcasted_iota(jnp.int32, (h, w - 1), 0)      # r
    cj = jax.lax.broadcasted_iota(jnp.int32, (h, w - 1), 1)      # l
    w_w = ((1.0 + (rj == 1).astype(f32) + (rj == h - 2).astype(f32))
           * (1.0 + (cj == 0).astype(f32) + (cj == w - 2).astype(f32)))
    acc_w_ref[...] += d_w * w_w

    # ---- single cross-lane reduction, once per core ---------------------------
    @pl.when(step == pl.num_programs(1) - 1)
    def _finalize():
        h_out_ref[...] = jnp.sum(acc_h_ref[...], keepdims=True)
        w_out_ref[...] = jnp.sum(acc_w_ref[...], keepdims=True)


def _round_up(x, m):
    return (x + m - 1) // m * m


def _pick_planes_per_block(bc, plane_vmem_bytes, target_bytes):
    """Largest divisor of `bc` whose block stays under ~target_bytes (VMEM)."""
    tb = int(max(1, min(bc, target_bytes // max(plane_vmem_bytes, 1))))
    while bc % tb:
        tb -= 1
    return tb


def tv_loss(x, tv_loss_weight=0.015, block_target_bytes=2 * 1024 * 1024):
    """Matches TV_loss.forward for NCHW input (reflection pad of 1)."""
    b, c, h, w = x.shape
    if h < 2 or w < 2:
        raise ValueError("ReflectionPad2d(1) requires H >= 2 and W >= 2.")
    bc = b * c
    xr = x.reshape(bc, h, w)          # free reshape, no data movement

    # Per-plane VMEM footprint after Mosaic's (8, 128) tiling (f32 compute),
    # so small planes (lane-padded 8x) cannot overshoot the VMEM budget.
    plane_vmem_bytes = _round_up(h, 8) * _round_up(w, 128) * 4
    tb = _pick_planes_per_block(bc, plane_vmem_bytes, block_target_bytes)
    nblk = bc // tb

    # Outer "parallel" axis: split the plane-block loop across the two
    # TensorCores on dual-core chips (v7x); plain outer loop on v5e/v6e.
    p = 2 if (nblk >= 2 and nblk % 2 == 0) else 1
    steps = nblk // p

    h_sum, w_sum = pl.pallas_call(
        _tv_loss_kernel,
        out_shape=(
            jax.ShapeDtypeStruct((p, 1, 1), jnp.float32),
            jax.ShapeDtypeStruct((p, 1, 1), jnp.float32),
        ),
        grid_spec=pltpu.PrefetchScalarGridSpec(
            num_scalar_prefetch=0,
            grid=(p, steps),
            in_specs=[
                pl.BlockSpec((tb, h, w), lambda pi, i: (pi * steps + i, 0, 0)),
            ],
            out_specs=[
                pl.BlockSpec((None, 1, 1), lambda pi, i: (pi, 0, 0)),
                pl.BlockSpec((None, 1, 1), lambda pi, i: (pi, 0, 0)),
            ],
            scratch_shapes=[
                pltpu.VMEM((h - 1, w), jnp.float32),
                pltpu.VMEM((h, w - 1), jnp.float32),
            ],
        ),
        compiler_params=pltpu.CompilerParams(
            dimension_semantics=("parallel", "arbitrary"),
            vmem_limit_bytes=32 * 1024 * 1024,
        ),
    )(xr)

    h_tv = jnp.sum(h_sum)             # sum the (<=2) per-core partials
    w_tv = jnp.sum(w_sum)

    count_h = c * (h + 1) * (w + 2)   # _tensor_size(x_padded[:, :, 1:, :])
    count_w = c * (h + 2) * (w + 1)   # _tensor_size(x_padded[:, :, :, 1:])

    return tv_loss_weight * 2.0 * (h_tv / count_h + w_tv / count_w) / b


def _reference_tv_loss(x, tv_loss_weight=0.015):
    b, c, h, w = x.shape
    xp = jnp.pad(x, ((0, 0), (0, 0), (1, 1), (1, 1)), mode="reflect")
    count_h = c * (h + 1) * (w + 2)
    count_w = c * (h + 2) * (w + 1)
    h_tv = jnp.sum(jnp.abs(xp[:, :, 1:, :] - xp[:, :, :-1, :]))
    w_tv = jnp.sum(jnp.abs(xp[:, :, :, 1:] - xp[:, :, :, :-1]))
    return tv_loss_weight * 2.0 * (h_tv / count_h + w_tv / count_w) / b


if __name__ == "__main__":
    key = jax.random.PRNGKey(0)
    x = jax.random.normal(key, (2, 4, 16, 16), dtype=jnp.float32)

    # Default path: all planes in a single block (grid (1, 1)).
    out = tv_loss(x)
    jax.block_until_ready(out)
    ref = _reference_tv_loss(x)
    assert jnp.allclose(out, ref, rtol=1e-5, atol=1e-6), (out, ref)

    # Force a tiny block target to also exercise the multi-step accumulation
    # and the dual-core (parallel outer axis) path on the same small input.
    out2 = tv_loss(x, block_target_bytes=4096)
    jax.block_until_ready(out2)
    assert jnp.allclose(out2, ref, rtol=1e-5, atol=1e-6), (out2, ref)

    print("KERNEL_OK")
</pallas_src>

<mosaic_0001>
module attributes {stable_mosaic.version = 11 : i64} {
  func.func @_tv_loss_kernel(%arg0: i32, %arg1: i32, %arg2: memref<8x16x16xf32, #tpu.memory_space<vmem>>, %arg3: memref<1x1x1xf32, #tpu.memory_space<vmem>>, %arg4: memref<1x1x1xf32, #tpu.memory_space<vmem>>, %arg5: memref<15x16xf32, #tpu.memory_space<vmem>>, %arg6: memref<16x15xf32, #tpu.memory_space<vmem>>) attributes {dimension_semantics = [#tpu.dimension_semantics<parallel>, #tpu.dimension_semantics<arbitrary>], iteration_bounds = array<i64: 1, 1>, scalar_prefetch = 0 : i64, scratch_operands = 2 : i64, tpu.core_type = #tpu.core_type<tc>, window_params = [{transform_indices = @transform_0, window_bounds = array<i64: 8, 16, 16>}, {transform_indices = @transform_1, window_bounds = array<i64: 1, 1, 1>}, {transform_indices = @transform_2, window_bounds = array<i64: 1, 1, 1>}]} {
    %c0_i32 = arith.constant 0 : i32
    %0 = arith.cmpi eq, %arg1, %c0_i32 : i32
    %1 = arith.extui %0 : i1 to i32
    %c0_i32_0 = arith.constant 0 : i32
    %2 = arith.cmpi ne, %1, %c0_i32_0 : i32
    scf.if %2 {
      %cst_24 = arith.constant 0.000000e+00 : f32
      %75 = vector.broadcast %cst_24 : f32 to vector<15x16xf32>
      %c0_25 = arith.constant 0 : index
      %c0_26 = arith.constant 0 : index
      %76 = vector.load %arg5[%c0_25, %c0_26] : memref<15x16xf32, #tpu.memory_space<vmem>>, vector<15x16xf32>
      tpu.vector_store %arg5[%c0_25, %c0_26], %75 {strides = array<i32>} : memref<15x16xf32, #tpu.memory_space<vmem>>, vector<15x16xf32>,
      %cst_27 = arith.constant 0.000000e+00 : f32
      %77 = vector.broadcast %cst_27 : f32 to vector<16x15xf32>
      %c0_28 = arith.constant 0 : index
      %c0_29 = arith.constant 0 : index
      %78 = vector.load %arg6[%c0_28, %c0_29] : memref<16x15xf32, #tpu.memory_space<vmem>>, vector<16x15xf32>
      tpu.vector_store %arg6[%c0_28, %c0_29], %77 {strides = array<i32>} : memref<16x15xf32, #tpu.memory_space<vmem>>, vector<16x15xf32>,
    } else {
    }
    %c0 = arith.constant 0 : index
    %c0_1 = arith.constant 0 : index
    %c0_2 = arith.constant 0 : index
    %3 = vector.load %arg2[%c0, %c0_1, %c0_2] : memref<8x16x16xf32, #tpu.memory_space<vmem>>, vector<8x16x16xf32>
    %4 = vector.extract_strided_slice %3 {offsets = [0, 1, 0], sizes = [8, 15, 16], strides = [1, 1, 1]} : vector<8x16x16xf32> to vector<8x15x16xf32>
    %5 = vector.extract_strided_slice %3 {offsets = [0, 0, 0], sizes = [8, 15, 16], strides = [1, 1, 1]} : vector<8x16x16xf32> to vector<8x15x16xf32>
    %6 = arith.subf %4, %5 : vector<8x15x16xf32>
    %7 = math.absf %6 : vector<8x15x16xf32>
    %cst = arith.constant dense<0.000000e+00> : vector<15x16xf32>
    %8 = vector.multi_reduction <add>, %7, %cst [0] : vector<8x15x16xf32> to vector<15x16xf32>
    %9 = tpu.iota {dimensions = array<i32: 0>} : vector<15x16xi32>
    %10 = tpu.iota {dimensions = array<i32: 1>} : vector<15x16xi32>
    %c0_i32_3 = arith.constant 0 : i32
    %11 = vector.broadcast %c0_i32_3 : i32 to vector<15x16xi32>
    %12 = arith.cmpi eq, %9, %11 : vector<15x16xi32>
    %13 = arith.extui %12 : vector<15x16xi1> to vector<15x16xi32>
    %14 = arith.sitofp %13 : vector<15x16xi32> to vector<15x16xf32>
    %cst_4 = arith.constant 1.000000e+00 : f32
    %15 = vector.broadcast %cst_4 : f32 to vector<15x16xf32>
    %16 = arith.addf %15, %14 : vector<15x16xf32>
    %c14_i32 = arith.constant 14 : i32
    %17 = vector.broadcast %c14_i32 : i32 to vector<15x16xi32>
    %18 = arith.cmpi eq, %9, %17 : vector<15x16xi32>
    %19 = arith.extui %18 : vector<15x16xi1> to vector<15x16xi32>
    %20 = arith.sitofp %19 : vector<15x16xi32> to vector<15x16xf32>
    %21 = arith.addf %16, %20 : vector<15x16xf32>
    %c1_i32 = arith.constant 1 : i32
    %22 = vector.broadcast %c1_i32 : i32 to vector<15x16xi32>
    %23 = arith.cmpi eq, %10, %22 : vector<15x16xi32>
    %24 = arith.extui %23 : vector<15x16xi1> to vector<15x16xi32>
    %25 = arith.sitofp %24 : vector<15x16xi32> to vector<15x16xf32>
    %cst_5 = arith.constant 1.000000e+00 : f32
    %26 = vector.broadcast %cst_5 : f32 to vector<15x16xf32>
    %27 = arith.addf %26, %25 : vector<15x16xf32>
    %c14_i32_6 = arith.constant 14 : i32
    %28 = vector.broadcast %c14_i32_6 : i32 to vector<15x16xi32>
    %29 = arith.cmpi eq, %10, %28 : vector<15x16xi32>
    %30 = arith.extui %29 : vector<15x16xi1> to vector<15x16xi32>
    %31 = arith.sitofp %30 : vector<15x16xi32> to vector<15x16xf32>
    %32 = arith.addf %27, %31 : vector<15x16xf32>
    %33 = arith.mulf %21, %32 : vector<15x16xf32>
    %c0_7 = arith.constant 0 : index
    %c0_8 = arith.constant 0 : index
    %34 = vector.load %arg5[%c0_7, %c0_8] : memref<15x16xf32, #tpu.memory_space<vmem>>, vector<15x16xf32>
    %35 = arith.mulf %8, %33 : vector<15x16xf32>
    %36 = arith.addf %34, %35 : vector<15x16xf32>
    %c0_9 = arith.constant 0 : index
    %c0_10 = arith.constant 0 : index
    %37 = vector.load %arg5[%c0_9, %c0_10] : memref<15x16xf32, #tpu.memory_space<vmem>>, vector<15x16xf32>
    tpu.vector_store %arg5[%c0_9, %c0_10], %36 {strides = array<i32>} : memref<15x16xf32, #tpu.memory_space<vmem>>, vector<15x16xf32>,
    %38 = vector.extract_strided_slice %3 {offsets = [0, 0, 1], sizes = [8, 16, 15], strides = [1, 1, 1]} : vector<8x16x16xf32> to vector<8x16x15xf32>
    %39 = vector.extract_strided_slice %3 {offsets = [0, 0, 0], sizes = [8, 16, 15], strides = [1, 1, 1]} : vector<8x16x16xf32> to vector<8x16x15xf32>
    %40 = arith.subf %38, %39 : vector<8x16x15xf32>
    %41 = math.absf %40 : vector<8x16x15xf32>
    %cst_11 = arith.constant dense<0.000000e+00> : vector<16x15xf32>
    %42 = vector.multi_reduction <add>, %41, %cst_11 [0] : vector<8x16x15xf32> to vector<16x15xf32>
    %43 = tpu.iota {dimensions = array<i32: 0>} : vector<16x15xi32>
    %44 = tpu.iota {dimensions = array<i32: 1>} : vector<16x15xi32>
    %c1_i32_12 = arith.constant 1 : i32
    %45 = vector.broadcast %c1_i32_12 : i32 to vector<16x15xi32>
    %46 = arith.cmpi eq, %43, %45 : vector<16x15xi32>
    %47 = arith.extui %46 : vector<16x15xi1> to vector<16x15xi32>
    %48 = arith.sitofp %47 : vector<16x15xi32> to vector<16x15xf32>
    %cst_13 = arith.constant 1.000000e+00 : f32
    %49 = vector.broadcast %cst_13 : f32 to vector<16x15xf32>
    %50 = arith.addf %49, %48 : vector<16x15xf32>
    %c14_i32_14 = arith.constant 14 : i32
    %51 = vector.broadcast %c14_i32_14 : i32 to vector<16x15xi32>
    %52 = arith.cmpi eq, %43, %51 : vector<16x15xi32>
    %53 = arith.extui %52 : vector<16x15xi1> to vector<16x15xi32>
    %54 = arith.sitofp %53 : vector<16x15xi32> to vector<16x15xf32>
    %55 = arith.addf %50, %54 : vector<16x15xf32>
    %c0_i32_15 = arith.constant 0 : i32
    %56 = vector.broadcast %c0_i32_15 : i32 to vector<16x15xi32>
    %57 = arith.cmpi eq, %44, %56 : vector<16x15xi32>
    %58 = arith.extui %57 : vector<16x15xi1> to vector<16x15xi32>
    %59 = arith.sitofp %58 : vector<16x15xi32> to vector<16x15xf32>
    %cst_16 = arith.constant 1.000000e+00 : f32
    %60 = vector.broadcast %cst_16 : f32 to vector<16x15xf32>
    %61 = arith.addf %60, %59 : vector<16x15xf32>
    %c14_i32_17 = arith.constant 14 : i32
    %62 = vector.broadcast %c14_i32_17 : i32 to vector<16x15xi32>
    %63 = arith.cmpi eq, %44, %62 : vector<16x15xi32>
    %64 = arith.extui %63 : vector<16x15xi1> to vector<16x15xi32>
    %65 = arith.sitofp %64 : vector<16x15xi32> to vector<16x15xf32>
    %66 = arith.addf %61, %65 : vector<16x15xf32>
    %67 = arith.mulf %55, %66 : vector<16x15xf32>
    %c0_18 = arith.constant 0 : index
    %c0_19 = arith.constant 0 : index
    %68 = vector.load %arg6[%c0_18, %c0_19] : memref<16x15xf32, #tpu.memory_space<vmem>>, vector<16x15xf32>
    %69 = arith.mulf %42, %67 : vector<16x15xf32>
    %70 = arith.addf %68, %69 : vector<16x15xf32>
    %c0_20 = arith.constant 0 : index
    %c0_21 = arith.constant 0 : index
    %71 = vector.load %arg6[%c0_20, %c0_21] : memref<16x15xf32, #tpu.memory_space<vmem>>, vector<16x15xf32>
    tpu.vector_store %arg6[%c0_20, %c0_21], %70 {strides = array<i32>} : memref<16x15xf32, #tpu.memory_space<vmem>>, vector<16x15xf32>,
    %c0_i32_22 = arith.constant 0 : i32
    %72 = arith.cmpi eq, %arg1, %c0_i32_22 : i32
    %73 = arith.extui %72 : i1 to i32
    %c0_i32_23 = arith.constant 0 : i32
    %74 = arith.cmpi ne, %73, %c0_i32_23 : i32
    scf.if %74 {
      %c0_24 = arith.constant 0 : index
      %c0_25 = arith.constant 0 : index
      %75 = vector.load %arg5[%c0_24, %c0_25] : memref<15x16xf32, #tpu.memory_space<vmem>>, vector<15x16xf32>
      %76 = vector.shape_cast %75 : vector<15x16xf32> to vector<1x15x16xf32>
      %cst_26 = arith.constant dense<0.000000e+00> : vector<1xf32>
      %77 = vector.multi_reduction <add>, %76, %cst_26 [1, 2] : vector<1x15x16xf32> to vector<1xf32>
      %78 = vector.shape_cast %77 : vector<1xf32> to vector<1x1x1xf32>
      %79 = vector.extract %78[0, 0, 0] : f32 from vector<1x1x1xf32>
      %80 = vector.broadcast %79 : f32 to vector<1x1xf32>
      %c0_27 = arith.constant 0 : index
      %c0_28 = arith.constant 0 : index
      %c0_29 = arith.constant 0 : index
      %81 = vector.load %arg3[%c0_27, %c0_28, %c0_29] : memref<1x1x1xf32, #tpu.memory_space<vmem>>, vector<1x1x1xf32>
      %82 = vector.shape_cast %81 : vector<1x1x1xf32> to vector<1x1xf32>
      %83 = vector.shape_cast %80 : vector<1x1xf32> to vector<1x1x1xf32>
      tpu.vector_store %arg3[%c0_27, %c0_28, %c0_29], %83 {strides = array<i32>} : memref<1x1x1xf32, #tpu.memory_space<vmem>>, vector<1x1x1xf32>,
      %c0_30 = arith.constant 0 : index
      %c0_31 = arith.constant 0 : index
      %84 = vector.load %arg6[%c0_30, %c0_31] : memref<16x15xf32, #tpu.memory_space<vmem>>, vector<16x15xf32>
      %85 = vector.shape_cast %84 : vector<16x15xf32> to vector<1x16x15xf32>
      %cst_32 = arith.constant dense<0.000000e+00> : vector<1xf32>
      %86 = vector.multi_reduction <add>, %85, %cst_32 [1, 2] : vector<1x16x15xf32> to vector<1xf32>
      %87 = vector.shape_cast %86 : vector<1xf32> to vector<1x1x1xf32>
      %88 = vector.extract %87[0, 0, 0] : f32 from vector<1x1x1xf32>
      %89 = vector.broadcast %88 : f32 to vector<1x1xf32>
      %c0_33 = arith.constant 0 : index
      %c0_34 = arith.constant 0 : index
      %c0_35 = arith.constant 0 : index
      %90 = vector.load %arg4[%c0_33, %c0_34, %c0_35] : memref<1x1x1xf32, #tpu.memory_space<vmem>>, vector<1x1x1xf32>
      %91 = vector.shape_cast %90 : vector<1x1x1xf32> to vector<1x1xf32>
      %92 = vector.shape_cast %89 : vector<1x1xf32> to vector<1x1x1xf32>
      tpu.vector_store %arg4[%c0_33, %c0_34, %c0_35], %92 {strides = array<i32>} : memref<1x1x1xf32, #tpu.memory_space<vmem>>, vector<1x1x1xf32>,
    } else {
    }
    return
  }
  func.func @transform_0(%arg0: i32, %arg1: i32) -> (i32, i32, i32) {
    %c1_i32 = arith.constant 1 : i32
    %0 = arith.muli %arg0, %c1_i32 : i32
    %1 = arith.addi %0, %arg1 : i32
    %c0_i32 = arith.constant 0 : i32
    %c0_i32_0 = arith.constant 0 : i32
    %c0_i32_1 = arith.constant 0 : i32
    return %1, %c0_i32, %c0_i32_0 : i32, i32, i32
  }
  func.func @transform_1(%arg0: i32, %arg1: i32) -> (i32, i32, i32) {
    %c0_i32 = arith.constant 0 : i32
    %c0_i32_0 = arith.constant 0 : i32
    %c0_i32_1 = arith.constant 0 : i32
    return %arg0, %c0_i32, %c0_i32_0 : i32, i32, i32
  }
  func.func @transform_2(%arg0: i32, %arg1: i32) -> (i32, i32, i32) {
    %c0_i32 = arith.constant 0 : i32
    %c0_i32_0 = arith.constant 0 : i32
    %c0_i32_1 = arith.constant 0 : i32
    return %arg0, %c0_i32, %c0_i32_0 : i32, i32, i32
  }
}

</mosaic_0001>

<bundles_post_ra>
// kernel: tpu_custom_call.1
= control target key start
LH: loop header
LB: loop body
LE: loop exit
PB: predicated region body
PF: predicated region fallthrough
CT: control target
= control target key end

     0   :  { %8 = vsyncpa [#allocation5], 0  ;;  %s806_s0 = inlined_call_operand.hbm [shape: f32[8,16,16], index: 0, kind: input, shape index: {}]   ;;  %s807_s1 = inlined_call_operand.hbm [shape: f32[1,1,1], index: 1, kind: output, shape index: {0}]   ;;  %s808_s2 = inlined_call_operand.hbm [shape: f32[1,1,1], index: 2, kind: output, shape index: {1}]  }
   0x1   :  { %9 = vsyncpa [#allocation6], 0 }
   0x2   :  { %10 = vsyncpa [#allocation9], 0  ;;  %s544_s9 = smov [#allocation4]   ;;  %s472_s13 = scalar_lea.hbm %s806_s0, 2048 }
   0x3   :  { %s21_s10 = sshll.u32 %s544_s9, 4  ;;  %p473_p0 = scmp.ne.s32.totalorder %s806_s0, %s472_s13  ;;  %s22_s10 = int_to_ptr.vmem [resolvable:$true] %s21_s10 }
   0x4   :  { %p476_p1 = scmp.lt.u32.totalorder %s472_s13, %s806_s0 }
   0x6   :  { %p478_p2 = pnand %p476_p1, %p473_p0 }
   0x8   :  { %481 = shalt.err (!%p478_p2)
}
   0x9   :  { %s482_s18 = scalar_lea.vmem %s22_s10, 2048  ;;  %p487_p4 = scmp.lt.s32.totalorder %s22_s10, %s22_s10 }
   0xa   :  { %p483_p3 = scmp.ne.s32.totalorder %s22_s10, %s482_s18  ;;  %p488_p5 = scmp.lt.s32.totalorder %s482_s18, %s482_s18 }
   0xc   :  { %p489_p6 = por %p488_p5, %p487_p4 }
   0xe   :  { %p490_p7 = pnand %p489_p6, %p483_p3 }
  0x10   :  { %493 = shalt.err (!%p490_p7)
}
  0x11   :  { %s545_s19 = smov 128   ;;  %s546_s20 = smov 8  }
  0x12   :  { %27 = dma.hbm_to_vmem [thread:$0]  %s806_s0, 2048, %s22_s10, [#allocation5], %s545_s19, %s545_s19, %s546_s20  }
  0x13   :  { %538 = dma.done.wait [#allocation5], 2048  }
  0x14   :  { %539 = vsyncadd [#allocation5], 4294965248  ;;  %v181_v0 = vlaneseq  ;;  %vm37_vm0 = vcmask 130048   ;;  %v547_v3 = vmov 0.0   ;;  %vm149_vm1 = vcmask 130049   ;;  %v591_v10 = vld [vmem:[#allocation4 + $0x10] sm:$0xff] }
  0x15   :  { %38 = vst.msk [vmem:[#allocation2] sm:$0xff] %vm37_vm0, %v547_v3  ;;  %vm76_vm5 = vcmask 1040384   ;;  %v593_v11 = vld [vmem:[#allocation4] sm:$0xff]  ;;  %v595_v12 = vld [vmem:[#allocation4 + $0x18] sm:$0xff]  ;;  %s548_s0 = smov 1   ;;  %v80_v16 = vrot.slane %v591_v10, 7 }
  0x16   :  { %v579_v1 = vshrl.u32 %v181_v0, 7  ;;  %v185_v2 = vand.u32 127, %v181_v0  ;;  %240 = vrot.lane.b32.xlu1 %v591_v10, %s548_s0  ;;  %236 = vrot.lane.b32.xlu0 %v593_v11, %s548_s0  ;;  %v77_v17 = vrot.slane %v593_v11, 7  ;;  %v81_v18 = vrot.slane %v595_v12, 7  ;;  %v611_v19 = vld [vmem:[#allocation4 + $0x8] sm:$0xff]  ;;  %v615_v21 = vld [vmem:[#allocation4 + $0x20] sm:$0xff] }
  0x17   :  { %v613_v20 = vld [vmem:[#allocation4 + $0x28] sm:$0xff]  ;;  %v78_v22 = vrot.slane %v611_v19, 7  ;;  %v83_v24 = vrot.slane %v615_v21, 7  ;;  %v620_v25 = vld [vmem:[#allocation4 + $0x38] sm:$0xff]  ;;  %v119_v27 = vsub.f32 %v591_v10, %v80_v16  ;;  %v639_v39 = vld [vmem:[#allocation4 + $0x30] sm:$0xff]  ;;  %vm41_vm9 = vcmask 121856  }
  0x18   :  { %v183_v4 = vadd.s32 8, %v579_v1  ;;  %vm186_vm2 = vcmp.eq.s32.totalorder %v579_v1, 0  ;;  %vm202_vm3 = vcmp.eq.s32.totalorder %v185_v2, 1  ;;  %vm206_vm4 = vcmp.eq.s32.totalorder %v185_v2, 14  ;;  %v641_v40 = vld [vmem:[#allocation4 + $0x48] sm:$0xff]  ;;  %v658_v57 = vld [vmem:[#allocation4 + $0x40] sm:$0xff] }
  0x19   :  { %v454_v5 = vsel %vm186_vm2, 1.0, %v547_v3  ;;  %v456_v6 = vsel %vm202_vm3, 1.0, %v547_v3  ;;  %vm357_vm6 = vcmp.eq.s32.totalorder %v185_v2, 0  ;;  %v588_v8 = vsel %vm206_vm4, 1.0, %v547_v3  ;;  %v660_v58 = vld [vmem:[#allocation4 + $0x58] sm:$0xff]  ;;  %v664_v63 = vld [vmem:[#allocation4 + $0x50] sm:$0xff] }
  0x1a   :  { %vm195_vm7 = vcmp.eq.s32.totalorder %v183_v4, 14  ;;  %v205_v7 = vadd.f32 1.0, %v456_v6  ;;  %v459_v9 = vsel %vm357_vm6, 1.0, %v547_v3  ;;  %v597_v13 = vadd.f32 1.0, %v454_v5  ;;  %242 = vrot.lane.b32.xlu1 %v595_v12, %s548_s0  ;;  %238 = vrot.lane.b32.xlu0 %v611_v19, %s548_s0  ;;  %v666_v0 = vld [vmem:[#allocation4 + $0x68] sm:$0xff]  ;;  %v668_v2 = vld [vmem:[#allocation4 + $0x60] sm:$0xff] }
  0x1b   :  { %v600_v14 = vsel %vm195_vm7, 1.0, %v547_v3  ;;  %v602_v15 = vadd.f32 1.0, %v459_v9  ;;  %v84_v23 = vrot.slane %v613_v20, 7  ;;  %v117_v28 = vsub.f32 %v593_v11, %v77_v17  ;;  %43 = vst.msk [vmem:[#allocation3 + $0x8] sm:$0xff] %vm41_vm9, %v547_v3  ;;  %42 = vst.msk [vmem:[#allocation3] sm:$0xff] %vm41_vm9, %v547_v3  ;;  %s549_s23 = smov 127  }
  0x1c   :  { %v623_v26 = vadd.f32 %v588_v8, %v205_v7  ;;  %v82_v29 = vsel %vm76_vm5, %v80_v16, %v81_v18  ;;  %v87_v30 = vrot.slane %v620_v25, 7  ;;  %v79_v32 = vsel %vm76_vm5, %v77_v17, %v78_v22  ;;  %s550_s24 = smov [#allocation7]  }
  0x1d   :  { %v120_v31 = vsub.f32 %v595_v12, %v82_v29  ;;  %v85_v33 = vsel %vm76_vm5, %v83_v24, %v84_v23  ;;  %v121_v34 = vsub.f32 %v615_v21, %v83_v24  ;;  %v135_v35 = vand.u32 2147483647, %v119_v27  ;;  %s431_s25 = sshll.u32 %s550_s24, 4  ;;  %s432_s25 = int_to_ptr.vmem [resolvable:$true] %s431_s25 }
  0x1e   :  { %v133_v36 = vand.u32 2147483647, %v117_v28  ;;  %v118_v37 = vsub.f32 %v611_v19, %v79_v32  ;;  %v122_v38 = vsub.f32 %v613_v20, %v85_v33  ;;  %v86_v43 = vrot.slane %v639_v39, 7  ;;  %246 = vrot.lane.b32.xlu1 %v613_v20, %s548_s0  ;;  %244 = vrot.lane.b32.xlu0 %v615_v21, %s548_s0  ;;  %s494_s27 = scalar_lea.vmem %s432_s25, 16  ;;  %s498_s28 = scalar_lea.vmem %s432_s25, 32 }
  0x1f   :  { %v136_v41 = vand.u32 2147483647, %v120_v31  ;;  %v137_v42 = vand.u32 2147483647, %v121_v34  ;;  %v90_v44 = vrot.slane %v641_v40, 7  ;;  %v151_v45 = vsel %vm149_vm1, %v135_v35, 0.0  ;;  %p495_p8 = scmp.ne.s32.totalorder %s432_s25, %s494_s27  ;;  %p499_p9 = scmp.lt.s32.totalorder %s432_s25, %s432_s25 }
  0x20   :  { %v150_v46 = vsel %vm149_vm1, %v133_v36, 0.0  ;;  %v134_v47 = vand.u32 2147483647, %v118_v37  ;;  %v138_v48 = vand.u32 2147483647, %v122_v38  ;;  %v88_v52 = vsel %vm76_vm5, %v86_v43, %v87_v30  ;;  %v688_v36 = vld [vmem:[#allocation4 + $0x78] sm:$0xff]  ;;  %p500_p10 = scmp.lt.s32.totalorder %s498_s28, %s494_s27 }
  0x21   :  { %v152_v49 = vadd.f32 %v151_v45, %v150_v46  ;;  %v167_v50 = vsel %vm37_vm0, %v136_v41, 0.0  ;;  %v153_v51 = vsel %vm149_vm1, %v137_v42, 0.0  ;;  %v123_v55 = vsub.f32 %v639_v39, %v86_v43 }
  0x22   :  { %v166_v53 = vsel %vm37_vm0, %v134_v47, 0.0  ;;  %v169_v54 = vsel %vm37_vm0, %v138_v48, 0.0  ;;  %v124_v56 = vsub.f32 %v620_v25, %v88_v52  ;;  %v89_v61 = vrot.slane %v658_v57, 7  ;;  %250 = vrot.lane.b32.xlu1 %v620_v25, %s548_s0  ;;  %248 = vrot.lane.b32.xlu0 %v639_v39, %s548_s0  ;;  %v698_v47 = vld [vmem:[#allocation4 + $0x70] sm:$0xff]  ;;  %p501_p11 = por %p500_p10, %p499_p9 }
  0x23   :  { %v168_v59 = vadd.f32 %v167_v50, %v166_v53  ;;  %v154_v60 = vadd.f32 %v153_v51, %v152_v49  ;;  %v93_v62 = vrot.slane %v660_v58, 7  ;;  %v139_v4 = vand.u32 2147483647, %v123_v55 }
  0x24   :  { %v140_v5 = vand.u32 2147483647, %v124_v56  ;;  %v92_v6 = vrot.slane %v664_v63, 7  ;;  %v96_v7 = vrot.slane %v666_v0, 7  ;;  %vm347_vm8 = vcmp.eq.s32.totalorder %v579_v1, 1  ;;  %p502_p12 = pnand %p501_p11, %p495_p8 }
  0x25   :  { %v170_v9 = vadd.f32 %v169_v54, %v168_v59  ;;  %v91_v16 = vsel %vm76_vm5, %v89_v61, %v90_v44  ;;  %v125_v17 = vsub.f32 %v658_v57, %v89_v61  ;;  %v95_v18 = vrot.slane %v668_v2, 7 }
  0x26   :  { %v155_v22 = vsel %vm149_vm1, %v139_v4, 0.0  ;;  %v171_v23 = vsel %vm37_vm0, %v140_v5, 0.0  ;;  %v126_v24 = vsub.f32 %v641_v40, %v91_v16  ;;  %v94_v27 = vsel %vm76_vm5, %v92_v6, %v93_v62  ;;  %254 = vrot.lane.b32.xlu1 %v641_v40, %s548_s0  ;;  %252 = vrot.lane.b32.xlu0 %v658_v57, %s548_s0 }
  0x27   :  { %v156_v28 = vadd.f32 %v155_v22, %v154_v60  ;;  %v172_v29 = vadd.f32 %v171_v23, %v170_v9  ;;  %v141_v30 = vand.u32 2147483647, %v125_v17  ;;  %v127_v31 = vsub.f32 %v664_v63, %v92_v6 }
  0x28   :  { %v142_v32 = vand.u32 2147483647, %v126_v24  ;;  %v128_v33 = vsub.f32 %v660_v58, %v94_v27  ;;  %v97_v34 = vsel %vm76_vm5, %v95_v18, %v96_v7  ;;  %v129_v35 = vsub.f32 %v668_v2, %v95_v18 }
  0x29   :  { %v157_v37 = vsel %vm149_vm1, %v141_v30, 0.0  ;;  %v143_v38 = vand.u32 2147483647, %v127_v31  ;;  %v130_v41 = vsub.f32 %v666_v0, %v97_v34  ;;  %v99_v42 = vrot.slane %v688_v36, 7  ;;  %v212_v31 = vld [vmem:[#allocation2] sm:$0xff] }
  0x2a   :  { %v173_v43 = vsel %vm37_vm0, %v142_v32, 0.0  ;;  %v158_v44 = vadd.f32 %v157_v37, %v156_v28  ;;  %v144_v45 = vand.u32 2147483647, %v128_v33  ;;  %v145_v46 = vand.u32 2147483647, %v129_v35  ;;  %258 = vrot.lane.b32.xlu1 %v660_v58, %s548_s0  ;;  %256 = vrot.lane.b32.xlu0 %v664_v63, %s548_s0 }
  0x2b   :  { %v174_v48 = vadd.f32 %v173_v43, %v172_v29  ;;  %v159_v49 = vsel %vm149_vm1, %v143_v38, 0.0  ;;  %v146_v50 = vand.u32 2147483647, %v130_v41  ;;  %v98_v51 = vrot.slane %v698_v47, 7 }
  0x2c   :  { %v175_v52 = vsel %vm37_vm0, %v144_v45, 0.0  ;;  %v160_v53 = vadd.f32 %v159_v49, %v158_v44  ;;  %v161_v54 = vsel %vm149_vm1, %v145_v46, 0.0  ;;  %v201_v55 = vadd.f32 1.0, %v600_v14 }
  0x2d   :  { %v176_v56 = vadd.f32 %v175_v52, %v174_v48  ;;  %v177_v59 = vsel %vm37_vm0, %v146_v50, 0.0  ;;  %v100_v60 = vsel %vm76_vm5, %v98_v51, %v99_v42  ;;  %v131_v61 = vsub.f32 %v698_v47, %v98_v51 }
  0x2e   :  { %v162_v62 = vadd.f32 %v161_v54, %v160_v53  ;;  %v132_v4 = vsub.f32 %v688_v36, %v100_v60  ;;  %v210_v5 = vmul.f32 %v623_v26, %v597_v13  ;;  %v211_v7 = vmul.f32 %v623_v26, %v201_v55  ;;  %262 = vrot.lane.b32.xlu1 %v666_v0, %s548_s0 }
  0x2f   :  { %v178_v14 = vadd.f32 %v177_v59, %v176_v56  ;;  %v147_v6 = vand.u32 2147483647, %v131_v61  ;;  %v458_v9 = vsel %vm347_vm8, 1.0, %v547_v3  ;;  %v361_v23 = vadd.f32 %v588_v8, %v602_v15  ;;  %260 = vrot.lane.b32.xlu0 %v668_v2, %s548_s0 }
  0x30   :  { %v148_v16 = vand.u32 2147483647, %v132_v4  ;;  %v216_v17 = vrot.slane %v210_v5, 7  ;;  %v217_v22 = vrot.slane %v211_v7, 7  ;;  %v353_v24 = vadd.f32 1.0, %v458_v9 }
  0x31   :  { %v163_v18 = vsel %vm149_vm1, %v147_v6, 0.0  ;;  %vm225_vm10 = vcmask 1046528   ;;  %v363_v28 = vmul.f32 %v361_v23, %v201_v55  ;;  %vm39_vm11 = vcmask 129024  }
  0x32   :  { %v179_v13 = vsel %vm37_vm0, %v148_v16, 0.0  ;;  %v164_v26 = vadd.f32 %v163_v18, %v162_v62  ;;  %v218_v27 = vsel %vm76_vm5, %v216_v17, %v217_v22  ;;  %266 = vrot.lane.b32.xlu1 %v688_v36, %s548_s0  ;;  %v362_v30 = vmul.f32 %v361_v23, %v353_v24  ;;  %40 = vst.msk [vmem:[#allocation2 + $0x8] sm:$0x7f] %vm39_vm11, %v547_v3 }
  0x33   :  { %v180_v1 = vadd.f32 %v179_v13, %v178_v14  ;;  %264 = vrot.lane.b32.xlu0 %v698_v47, %s548_s0  ;;  %vm316_vm12 = vcmask 130056   ;;  %vm407_vm13 = vcmask 0  }
  0x34   :  { %v221_v8 = vmul.f32 %v216_v17, %v164_v26 }
  0x35   :  { %v222_v15 = vmul.f32 %v218_v27, %v180_v1 }
  0x36   :  { %v226_v29 = vrot.slane %v221_v8, 1  ;;  %370 = vrot.lane.b32.xlu1 %v363_v28, %s548_s0 }
  0x37   :  { %v227_v32 = vrot.slane %v222_v15, 1  ;;  %368 = vrot.lane.b32.xlu0 %v362_v30, %s548_s0 }
  0x39   :  { %v228_v33 = vsel %vm225_vm10, %v226_v29, %v227_v32  ;;  %v213_v4 = vld [vmem:[#allocation2 + $0x8] sm:$0x7f] }
  0x3a   :  { %v231_v34 = vadd.f32 %v228_v33, %v212_v31 }
  0x3c   :  { %233 = vst.msk [vmem:[#allocation2] sm:$0xff] %vm37_vm0, %v231_v34 }
  0x88   :  { %v241_v35 = vpop.permute.xlu1 %240  ;;  %v237_v37 = vpop.permute.xlu0 %236 }
  0x89   :  { %v286_v44 = vsub.f32 %v591_v10, %v241_v35  ;;  %v284_v45 = vsub.f32 %v593_v11, %v237_v37 }
  0x8b   :  { %v302_v53 = vand.u32 2147483647, %v286_v44  ;;  %v300_v54 = vand.u32 2147483647, %v284_v45 }
  0x8c   :  { %v243_v38 = vpop.permute.xlu1 %242  ;;  %v239_v41 = vpop.permute.xlu0 %238 }
  0x8d   :  { %v287_v46 = vsub.f32 %v595_v12, %v243_v38  ;;  %v285_v48 = vsub.f32 %v611_v19, %v239_v41  ;;  %v317_v61 = vsel %vm316_vm12, %v300_v54, 0.0 }
  0x8f   :  { %v303_v55 = vand.u32 2147483647, %v287_v46  ;;  %v301_v10 = vand.u32 2147483647, %v285_v48 }
  0x90   :  { %v247_v42 = vpop.permute.xlu1 %246  ;;  %v245_v43 = vpop.permute.xlu0 %244 }
  0x91   :  { %v289_v49 = vsub.f32 %v613_v20, %v247_v42  ;;  %v288_v50 = vsub.f32 %v615_v21, %v245_v43  ;;  %v318_v21 = vsel %vm316_vm12, %v302_v53, 0.0  ;;  %v333_v62 = vsel %vm316_vm12, %v303_v55, 0.0 }
  0x92   :  { %v332_v5 = vsel %vm316_vm12, %v301_v10, 0.0  ;;  %v319_v22 = vadd.f32 %v318_v21, %v317_v61  ;;  %v364_v21 = vld [vmem:[#allocation3] sm:$0xff] }
  0x93   :  { %v305_v56 = vand.u32 2147483647, %v289_v49  ;;  %v304_v19 = vand.u32 2147483647, %v288_v50  ;;  %v334_v23 = vadd.f32 %v333_v62, %v332_v5 }
  0x94   :  { %v251_v51 = vpop.permute.xlu1 %250  ;;  %v249_v52 = vpop.permute.xlu0 %248 }
  0x95   :  { %v291_v11 = vsub.f32 %v620_v25, %v251_v51  ;;  %v290_v12 = vsub.f32 %v639_v39, %v249_v52  ;;  %v232_v39 = vadd.f32 %v227_v32, %v213_v4  ;;  %v335_v6 = vsel %vm316_vm12, %v305_v56, 0.0 }
  0x96   :  { %v320_v7 = vsel %vm316_vm12, %v304_v19, 0.0  ;;  %v336_v27 = vadd.f32 %v335_v6, %v334_v23 }
  0x97   :  { %v307_v25 = vand.u32 2147483647, %v291_v11  ;;  %v306_v14 = vand.u32 2147483647, %v290_v12  ;;  %235 = vst.msk [vmem:[#allocation2 + $0x8] sm:$0x7f] %vm39_vm11, %v232_v39  ;;  %v321_v8 = vadd.f32 %v320_v7, %v319_v22 }
  0x98   :  { %v255_v59 = vpop.permute.xlu1 %254  ;;  %v253_v60 = vpop.permute.xlu0 %252 }
  0x99   :  { %v293_v3 = vsub.f32 %v641_v40, %v255_v59  ;;  %v292_v20 = vsub.f32 %v658_v57, %v253_v60  ;;  %v337_v13 = vsel %vm316_vm12, %v307_v25, 0.0  ;;  %v322_v26 = vsel %vm316_vm12, %v306_v14, 0.0 }
  0x9a   :  { %v338_v31 = vadd.f32 %v337_v13, %v336_v27  ;;  %v323_v32 = vadd.f32 %v322_v26, %v321_v8 }
  0x9b   :  { %v309_v16 = vand.u32 2147483647, %v293_v3  ;;  %v308_v57 = vand.u32 2147483647, %v292_v20  ;;  %v365_v20 = vld [vmem:[#allocation3 + $0x8] sm:$0xff] }
  0x9c   :  { %v259_v9 = vpop.permute.xlu1 %258  ;;  %v257_v40 = vpop.permute.xlu0 %256 }
  0x9d   :  { %v295_v17 = vsub.f32 %v660_v58, %v259_v9  ;;  %v294_v18 = vsub.f32 %v664_v63, %v257_v40  ;;  %v339_v29 = vsel %vm316_vm12, %v309_v16, 0.0  ;;  %v324_v58 = vsel %vm316_vm12, %v308_v57, 0.0 }
  0x9e   :  { %v340_v38 = vadd.f32 %v339_v29, %v338_v31  ;;  %v325_v41 = vadd.f32 %v324_v58, %v323_v32 }
  0x9f   :  { %v311_v24 = vand.u32 2147483647, %v295_v17  ;;  %v310_v1 = vand.u32 2147483647, %v294_v18 }
  0xa0   :  { %v263_v15 = vpop.permute.xlu1 %262 }
  0xa1   :  { %v261_v28 = vpop.permute.xlu0 %260  ;;  %v297_v63 = vsub.f32 %v666_v0, %v263_v15  ;;  %v341_v33 = vsel %vm316_vm12, %v311_v24, 0.0  ;;  %v326_v34 = vsel %vm316_vm12, %v310_v1, 0.0 }
  0xa2   :  { %v296_v30 = vsub.f32 %v668_v2, %v261_v28  ;;  %v342_v46 = vadd.f32 %v341_v33, %v340_v38  ;;  %v327_v48 = vadd.f32 %v326_v34, %v325_v41 }
  0xa3   :  { %v313_v35 = vand.u32 2147483647, %v297_v63 }
  0xa4   :  { %v312_v37 = vand.u32 2147483647, %v296_v30  ;;  %v267_v42 = vpop.permute.xlu1 %266 }
  0xa5   :  { %v265_v43 = vpop.permute.xlu0 %264  ;;  %v343_v44 = vsel %vm316_vm12, %v313_v35, 0.0  ;;  %v299_v0 = vsub.f32 %v688_v36, %v267_v42  ;;  %v392_v36 = vld [vmem:[#allocation2] sm:$0xff] }
  0xa6   :  { %v328_v45 = vsel %vm316_vm12, %v312_v37, 0.0  ;;  %v298_v2 = vsub.f32 %v698_v47, %v265_v43  ;;  %v344_v51 = vadd.f32 %v343_v44, %v342_v46  ;;  %v393_v47 = vld [vmem:[#allocation2 + $0x8] sm:$0x7f]  ;;  %v394_v59 = vsel %vm37_vm0, %v392_v36, 0.0 }
  0xa7   :  { %v315_v49 = vand.u32 2147483647, %v299_v0  ;;  %v329_v52 = vadd.f32 %v328_v45, %v327_v48  ;;  %v395_v60 = vsel %vm39_vm11, %v393_v47, 0.0 }
  0xa8   :  { %v314_v50 = vand.u32 2147483647, %v298_v2  ;;  %v371_v55 = vpop.permute.xlu1 %370  ;;  %v396_v3 = vadd.f32 %v395_v60, %v394_v59 }
  0xa9   :  { %v345_v53 = vsel %vm316_vm12, %v315_v49, 0.0  ;;  %v369_v10 = vpop.permute.xlu0 %368 }
  0xaa   :  { %v330_v54 = vsel %vm316_vm12, %v314_v50, 0.0  ;;  %v346_v11 = vadd.f32 %v345_v53, %v344_v51 }
  0xab   :  { %v331_v12 = vadd.f32 %v330_v54, %v329_v52 }
  0xac   :  { %v375_v56 = vmul.f32 %v371_v55, %v346_v11 }
  0xad   :  { %v374_v19 = vmul.f32 %v369_v10, %v331_v12 }
  0xae   :  { %380 = vrot.lane.b32.xlu1 %v375_v56, %s549_s23 }
  0xaf   :  { %378 = vrot.lane.b32.xlu0 %v374_v19, %s549_s23 }
  0xce   :  { %397 = vadd.xlane.f32.xlu0 %v396_v3 }
 0x120   :  { %v381_v61 = vpop.permute.xlu1 %380 }
 0x121   :  { %v379_v62 = vpop.permute.xlu0 %378  ;;  %v385_v4 = vadd.f32 %v381_v61, %v365_v20 }
 0x122   :  { %v384_v5 = vadd.f32 %v379_v62, %v364_v21 }
 0x123   :  { %388 = vst.msk [vmem:[#allocation3 + $0x8] sm:$0xff] %vm41_vm9, %v385_v4 }
 0x124   :  { %387 = vst.msk [vmem:[#allocation3] sm:$0xff] %vm41_vm9, %v384_v5 }
 0x12a   :  { %v410_v14 = vld [vmem:[#allocation3 + $0x8] sm:$0xff] }
 0x12b   :  { %v409_v25 = vld [vmem:[#allocation3] sm:$0xff]  ;;  %v412_v6 = vsel %vm41_vm9, %v410_v14, 0.0 }
 0x12c   :  { %v411_v39 = vsel %vm41_vm9, %v409_v25, 0.0 }
 0x12d   :  { %v413_v7 = vadd.f32 %v412_v6, %v411_v39 }
 0x12f   :  { %414 = vadd.xlane.f32.xlu1 %v413_v7 }
 0x15b   :  { %v398_v9 = vpop.xlane.xlu0 %397 }
 0x15c   :  { %v399_v40 = vrot.slane %v398_v9, 4 }
 0x15e   :  { %v400_v16 = vadd.f32 %v399_v40, %v398_v9 }
 0x160   :  { %v401_v57 = vrot.slane %v400_v16, 2 }
 0x162   :  { %v402_v17 = vadd.f32 %v401_v57, %v400_v16 }
 0x164   :  { %v403_v18 = vrot.slane %v402_v17, 1 }
 0x166   :  { %v404_v22 = vadd.f32 %v403_v18, %v402_v17 }
 0x168   :  { %460 = vpush %v404_v22 }
 0x199   :  { %s461_s26 = spop %460 }
 0x19a   :  { %v406_v23 = vstv %s461_s26 }
 0x19b   :  { %408 = vst.msk [vmem:[#allocation7] sm:$0x1] %vm407_vm13, %v406_v23 }
 0x19c   :  { %505 = shalt.err (!%p502_p12)
}
 0x19d   :  { %s506_s3 = scalar_lea.hbm %s807_s1, 16 }
 0x19e   :  { %p507_p13 = scmp.ne.s32.totalorder %s807_s1, %s506_s3  ;;  %p510_p0 = scmp.lt.u32.totalorder %s506_s3, %s807_s1 }
 0x1a0   :  { %p512_p1 = pnand %p510_p0, %p507_p13 }
 0x1a2   :  { %515 = shalt.err (!%p512_p1)
}
 0x1a3   :  { %434 = dma.vmem_to_hbm [thread:$0]  %s432_s25, 16, %s807_s1, [#allocation6]  }
 0x1a4   :  { %s551_s10 = smov [#allocation8]  }
 0x1a5   :  { %s441_s11 = sshll.u32 %s551_s10, 4  ;;  %s442_s11 = int_to_ptr.vmem [resolvable:$true] %s441_s11 }
 0x1a6   :  { %s516_s13 = scalar_lea.vmem %s442_s11, 16  ;;  %s520_s14 = scalar_lea.vmem %s442_s11, 32 }
 0x1a7   :  { %p517_p2 = scmp.ne.s32.totalorder %s442_s11, %s516_s13  ;;  %p521_p3 = scmp.lt.s32.totalorder %s442_s11, %s442_s11 }
 0x1a8   :  { %p522_p4 = scmp.lt.s32.totalorder %s520_s14, %s516_s13 }
 0x1aa   :  { %p523_p5 = por %p522_p4, %p521_p3 }
 0x1ac   :  { %p524_p6 = pnand %p523_p5, %p517_p2 }
 0x1bc   :  { %v415_v13 = vpop.xlane.xlu1 %414 }
 0x1bd   :  { %v416_v26 = vrot.slane %v415_v13, 4 }
 0x1bf   :  { %v417_v24 = vadd.f32 %v416_v26, %v415_v13 }
 0x1c1   :  { %v418_v1 = vrot.slane %v417_v24, 2 }
 0x1c3   :  { %v419_v27 = vadd.f32 %v418_v1, %v417_v24 }
 0x1c5   :  { %v420_v8 = vrot.slane %v419_v27, 1 }
 0x1c7   :  { %v421_v15 = vadd.f32 %v420_v8, %v419_v27 }
 0x1c9   :  { %462 = vpush %v421_v15 }
 0x1fa   :  { %s463_s12 = spop %462 }
 0x1fb   :  { %v423_v28 = vstv %s463_s12 }
 0x1fc   :  { %424 = vst.msk [vmem:[#allocation8] sm:$0x1] %vm407_vm13, %v423_v28 }
 0x1fd   :  { %527 = shalt.err (!%p524_p6)
}
 0x1fe   :  { %s528_s16 = scalar_lea.hbm %s808_s2, 16 }
 0x1ff   :  { %p529_p7 = scmp.ne.s32.totalorder %s808_s2, %s528_s16  ;;  %p532_p8 = scmp.lt.u32.totalorder %s528_s16, %s808_s2 }
 0x201   :  { %p534_p9 = pnand %p532_p8, %p529_p7 }
 0x203   :  { %537 = shalt.err (!%p534_p9)
}
 0x204   :  { %444 = dma.vmem_to_hbm [thread:$0]  %s442_s11, 16, %s808_s2, [#allocation9]  }
 0x205   :  { %540 = dma.done.wait [#allocation6], 16  }
 0x206   :  { %541 = vsyncadd [#allocation6], 4294967280 }
 0x207   :  { %542 = dma.done.wait [#allocation9], 16  }
 0x208   :  { %543 = vsyncadd [#allocation9], 4294967280 }
 0x209   :  { %451 = vsyncpa [#allocation5], 1 }
 0x20a   :  { %452 = vsyncpa [#allocation6], 1 }
 0x20b   :  { %453 = vsyncpa [#allocation9], 1 }

</bundles_post_ra>
